<compile_context>
chip_gen: v5e
topology: v5e:2x2
jax: 0.10.0
libtpu: 0.0.40
codegen_flags: <defaults>
</compile_context>

<pallas_src>
import jax
import jax.numpy as jnp
from jax import lax
from jax.experimental import pallas as pl
from jax.experimental.pallas import tpu as pltpu


FC1_DIMS = 256
FC2_DIMS = 256
TB_DEFAULT = 2048  # batch tile (rows); ~5 MiB VMEM footprint -> fine on v5e/v6e/v7x


def _round_up(x, m):
    return ((x + m - 1) // m) * m


def _critic_kernel(x_ref, w1_ref, w2_ref, w3_ref, b_ref, out_ref):
    # x_ref:  (tb, D)     f32
    # w1_ref: (D, 256)    bf16   (VMEM-resident across the grid)
    # w2_ref: (256, 256)  bf16   (VMEM-resident across the grid)
    # w3_ref: (1, 256)    bf16   (last layer stored as a row)
    # b_ref:  (3, 256)    f32    row0=b1, row1=b2, row2[0]=b3
    # out_ref:(1, tb)     f32    lane-dense output row for this batch tile
    tb = x_ref.shape[0]
    D = x_ref.shape[1]

    b1 = b_ref[0:1, :]          # (1, 256) f32
    b2 = b_ref[1:2, :]          # (1, 256) f32
    b3 = b_ref[2:3, 0:1]        # (1, 1)   f32

    if D <= 16:
        # Layer 1 on the VPU: D unrolled broadcast-FMAs in f32 (state stays f32;
        # a K=D matmul would be almost pure MXU pipeline-fill latency).
        x = x_ref[...]                                   # (tb, D) f32
        w1 = w1_ref[...].astype(jnp.float32)             # (D, 256) f32
        h1 = jnp.zeros((tb, FC1_DIMS), jnp.float32) + b1
        for d in range(D):                                # static unroll
            h1 = h1 + x[:, d:d + 1] * w1[d:d + 1, :]
    else:
        h1 = jnp.dot(x_ref[...].astype(jnp.bfloat16), w1_ref[...],
                     preferred_element_type=jnp.float32) + b1
    h1 = jnp.maximum(h1, 0.0)

    h2 = jnp.dot(h1.astype(jnp.bfloat16), w2_ref[...],
                 preferred_element_type=jnp.float32) + b2
    h2 = jnp.maximum(h2, 0.0)

    # Final layer (256 -> 1), produced lane-dense as a (1, tb) row:
    # contract the 256 axis of w3 (1, 256) against the 256 axis of h2 (tb, 256).
    v = lax.dot_general(w3_ref[...], h2.astype(jnp.bfloat16),
                        dimension_numbers=(((1,), (1,)), ((), ())),
                        preferred_element_type=jnp.float32)        # (1, tb)
    out_ref[...] = (v + b3).astype(out_ref.dtype)


def pack_params(params):
    """Convert f32 master params -> kernel-friendly packed representation.

    Returns (w1_bf16 (D,256), w2_bf16 (256,256), w3_row_bf16 (1,256),
             bias_packed_f32 (3,256)).
    """
    w1, b1, w2, b2, w3, b3 = params
    w1p = w1.astype(jnp.bfloat16)
    w2p = w2.astype(jnp.bfloat16)
    w3p = w3.reshape(1, FC2_DIMS).astype(jnp.bfloat16)
    bias = jnp.zeros((3, FC1_DIMS), jnp.float32)
    bias = bias.at[0, :].set(b1.reshape(-1))
    bias = bias.at[1, :].set(b2.reshape(-1))
    bias = bias.at[2, 0].set(b3.reshape(-1)[0])
    return w1p, w2p, w3p, bias


def critic_forward(state, packed_params, *, tb=None):
    """state: (B, input_dims) f32.  packed_params from pack_params().
    Returns value: (B, 1) f32."""
    w1p, w2p, w3p, bias = packed_params
    B, D = state.shape

    if tb is None:
        if B > TB_DEFAULT:
            tb = TB_DEFAULT
        elif B >= 16:
            # >= 2 grid steps so v7x's two TensorCores each get a tile.
            tb = _round_up(pl.cdiv(B, 2), 8)
        else:
            tb = _round_up(max(B, 1), 8)

    num_tiles = pl.cdiv(B, tb)   # ragged last block: OOB rows are garbage,
                                 # row-wise independent, sliced off below.

    flops = 2 * B * (D * FC1_DIMS + FC1_DIMS * FC2_DIMS + FC2_DIMS)
    bytes_accessed = (state.size * 4 + w1p.size * 2 + w2p.size * 2 +
                      w3p.size * 2 + bias.size * 4 + num_tiles * tb * 4)

    out = pl.pallas_call(
        _critic_kernel,
        out_shape=jax.ShapeDtypeStruct((num_tiles, tb), jnp.float32),
        grid=(num_tiles,),
        in_specs=[
            pl.BlockSpec((tb, D), lambda i: (i, 0)),      # state tile
            pl.BlockSpec(w1p.shape, lambda i: (0, 0)),    # w1 (resident)
            pl.BlockSpec(w2p.shape, lambda i: (0, 0)),    # w2 (resident)
            pl.BlockSpec(w3p.shape, lambda i: (0, 0)),    # w3 row (resident)
            pl.BlockSpec(bias.shape, lambda i: (0, 0)),   # packed biases
        ],
        out_specs=pl.BlockSpec((1, tb), lambda i: (i, 0)),  # lane-dense row
        compiler_params=pltpu.CompilerParams(
            dimension_semantics=("parallel",)),
        cost_estimate=pl.CostEstimate(
            flops=flops, transcendentals=0, bytes_accessed=bytes_accessed),
    )(state, w1p, w2p, w3p, bias)

    # (num_tiles, tb) row-major -> (num_tiles*tb, 1); drop ragged-tail rows.
    return out.reshape(num_tiles * tb, 1)[:B]


def init_params(key, input_dims):
    """f32 master params mimicking PyTorch nn.Linear default init
    (U[-1/sqrt(fan_in), +1/sqrt(fan_in)]).  Weights stored as (in, out)."""
    def linear(k, fan_in, fan_out):
        kw, kb = jax.random.split(k)
        bound = 1.0 / jnp.sqrt(fan_in)
        w = jax.random.uniform(kw, (fan_in, fan_out), jnp.float32, -bound, bound)
        b = jax.random.uniform(kb, (1, fan_out), jnp.float32, -bound, bound)
        return w, b

    k1, k2, k3 = jax.random.split(key, 3)
    w1, b1 = linear(k1, input_dims, FC1_DIMS)
    w2, b2 = linear(k2, FC1_DIMS, FC2_DIMS)
    w3, b3 = linear(k3, FC2_DIMS, 1)
    return (w1, b1, w2, b2, w3, b3)


def critic_forward_ref(state, params):
    """Pure-JAX f32 reference of the same forward pass."""
    w1, b1, w2, b2, w3, b3 = params
    h1 = jnp.maximum(state @ w1 + b1, 0.0)
    h2 = jnp.maximum(h1 @ w2 + b2, 0.0)
    return h2 @ w3 + b3


# TODO(synk): optimizer (Adam) step and checkpoint save/load from the PyTorch
# module are host-side / training concerns and are not part of forward().

if __name__ == "__main__":
    key = jax.random.PRNGKey(0)
    k_params, k_state = jax.random.split(key)

    batch = 8
    input_dims = 8  # e.g. an 8-dim observation vector (input_dims=(8,))

    params = init_params(k_params, input_dims)
    packed = pack_params(params)
    state = jax.random.normal(k_state, (batch, input_dims), jnp.float32)

    value = critic_forward(state, packed)
    value = jax.block_until_ready(value)

    ref = critic_forward_ref(state, params)
    assert value.shape == (batch, 1)
    # bf16 weights (and bf16 activations on layers 2/3) -> relaxed tolerance.
    assert jnp.allclose(value, ref, atol=2e-2, rtol=2e-2), (
        f"max abs err {jnp.max(jnp.abs(value - ref))}")

    print("KERNEL_OK")
</pallas_src>

<mosaic_0001>
module attributes {stable_mosaic.version = 11 : i64} {
  func.func @_critic_kernel(%arg0: i32, %arg1: memref<8x8xf32, #tpu.memory_space<vmem>>, %arg2: memref<8x256xbf16, #tpu.memory_space<vmem>>, %arg3: memref<256x256xbf16, #tpu.memory_space<vmem>>, %arg4: memref<1x256xbf16, #tpu.memory_space<vmem>>, %arg5: memref<3x256xf32, #tpu.memory_space<vmem>>, %arg6: memref<1x8xf32, #tpu.memory_space<vmem>>) attributes {dimension_semantics = [#tpu.dimension_semantics<parallel>], iteration_bounds = array<i64: 1>, scalar_prefetch = 0 : i64, scratch_operands = 0 : i64, tpu.core_type = #tpu.core_type<tc>, window_params = [{transform_indices = @transform_0, window_bounds = array<i64: 8, 8>}, {pipeline_mode = #tpu.pipeline_mode<synchronous>, transform_indices = @transform_1, window_bounds = array<i64: 8, 256>}, {pipeline_mode = #tpu.pipeline_mode<synchronous>, transform_indices = @transform_2, window_bounds = array<i64: 256, 256>}, {pipeline_mode = #tpu.pipeline_mode<synchronous>, transform_indices = @transform_3, window_bounds = array<i64: 1, 256>}, {pipeline_mode = #tpu.pipeline_mode<synchronous>, transform_indices = @transform_4, window_bounds = array<i64: 3, 256>}, {transform_indices = @transform_5, window_bounds = array<i64: 1, 8>}]} {
    %c0 = arith.constant 0 : index
    %c0_0 = arith.constant 0 : index
    %0 = vector.load %arg5[%c0, %c0_0] : memref<3x256xf32, #tpu.memory_space<vmem>>, vector<1x256xf32>
    %c1 = arith.constant 1 : index
    %c0_1 = arith.constant 0 : index
    %1 = vector.load %arg5[%c1, %c0_1] : memref<3x256xf32, #tpu.memory_space<vmem>>, vector<1x256xf32>
    %c2 = arith.constant 2 : index
    %c0_2 = arith.constant 0 : index
    %2 = vector.load %arg5[%c2, %c0_2] : memref<3x256xf32, #tpu.memory_space<vmem>>, vector<1x1xf32>
    %c0_3 = arith.constant 0 : index
    %c0_4 = arith.constant 0 : index
    %3 = vector.load %arg1[%c0_3, %c0_4] : memref<8x8xf32, #tpu.memory_space<vmem>>, vector<8x8xf32>
    %c0_5 = arith.constant 0 : index
    %c0_6 = arith.constant 0 : index
    %4 = vector.load %arg2[%c0_5, %c0_6] : memref<8x256xbf16, #tpu.memory_space<vmem>>, vector<8x256xbf16>
    %5 = arith.extf %4 : vector<8x256xbf16> to vector<8x256xf32>
    %cst = arith.constant 0.000000e+00 : f32
    %6 = vector.broadcast %cst : f32 to vector<8x256xf32>
    %7 = vector.broadcast %0 : vector<1x256xf32> to vector<8x256xf32>
    %8 = arith.addf %6, %7 : vector<8x256xf32>
    %9 = vector.extract_strided_slice %3 {offsets = [0, 0], sizes = [8, 1], strides = [1, 1]} : vector<8x8xf32> to vector<8x1xf32>
    %10 = vector.extract_strided_slice %5 {offsets = [0, 0], sizes = [1, 256], strides = [1, 1]} : vector<8x256xf32> to vector<1x256xf32>
    %11 = vector.broadcast %9 : vector<8x1xf32> to vector<8x256xf32>
    %12 = vector.broadcast %10 : vector<1x256xf32> to vector<8x256xf32>
    %13 = arith.mulf %11, %12 : vector<8x256xf32>
    %14 = arith.addf %8, %13 : vector<8x256xf32>
    %15 = vector.extract_strided_slice %3 {offsets = [0, 1], sizes = [8, 1], strides = [1, 1]} : vector<8x8xf32> to vector<8x1xf32>
    %16 = vector.extract_strided_slice %5 {offsets = [1, 0], sizes = [1, 256], strides = [1, 1]} : vector<8x256xf32> to vector<1x256xf32>
    %17 = vector.broadcast %15 : vector<8x1xf32> to vector<8x256xf32>
    %18 = vector.broadcast %16 : vector<1x256xf32> to vector<8x256xf32>
    %19 = arith.mulf %17, %18 : vector<8x256xf32>
    %20 = arith.addf %14, %19 : vector<8x256xf32>
    %21 = vector.extract_strided_slice %3 {offsets = [0, 2], sizes = [8, 1], strides = [1, 1]} : vector<8x8xf32> to vector<8x1xf32>
    %22 = vector.extract_strided_slice %5 {offsets = [2, 0], sizes = [1, 256], strides = [1, 1]} : vector<8x256xf32> to vector<1x256xf32>
    %23 = vector.broadcast %21 : vector<8x1xf32> to vector<8x256xf32>
    %24 = vector.broadcast %22 : vector<1x256xf32> to vector<8x256xf32>
    %25 = arith.mulf %23, %24 : vector<8x256xf32>
    %26 = arith.addf %20, %25 : vector<8x256xf32>
    %27 = vector.extract_strided_slice %3 {offsets = [0, 3], sizes = [8, 1], strides = [1, 1]} : vector<8x8xf32> to vector<8x1xf32>
    %28 = vector.extract_strided_slice %5 {offsets = [3, 0], sizes = [1, 256], strides = [1, 1]} : vector<8x256xf32> to vector<1x256xf32>
    %29 = vector.broadcast %27 : vector<8x1xf32> to vector<8x256xf32>
    %30 = vector.broadcast %28 : vector<1x256xf32> to vector<8x256xf32>
    %31 = arith.mulf %29, %30 : vector<8x256xf32>
    %32 = arith.addf %26, %31 : vector<8x256xf32>
    %33 = vector.extract_strided_slice %3 {offsets = [0, 4], sizes = [8, 1], strides = [1, 1]} : vector<8x8xf32> to vector<8x1xf32>
    %34 = vector.extract_strided_slice %5 {offsets = [4, 0], sizes = [1, 256], strides = [1, 1]} : vector<8x256xf32> to vector<1x256xf32>
    %35 = vector.broadcast %33 : vector<8x1xf32> to vector<8x256xf32>
    %36 = vector.broadcast %34 : vector<1x256xf32> to vector<8x256xf32>
    %37 = arith.mulf %35, %36 : vector<8x256xf32>
    %38 = arith.addf %32, %37 : vector<8x256xf32>
    %39 = vector.extract_strided_slice %3 {offsets = [0, 5], sizes = [8, 1], strides = [1, 1]} : vector<8x8xf32> to vector<8x1xf32>
    %40 = vector.extract_strided_slice %5 {offsets = [5, 0], sizes = [1, 256], strides = [1, 1]} : vector<8x256xf32> to vector<1x256xf32>
    %41 = vector.broadcast %39 : vector<8x1xf32> to vector<8x256xf32>
    %42 = vector.broadcast %40 : vector<1x256xf32> to vector<8x256xf32>
    %43 = arith.mulf %41, %42 : vector<8x256xf32>
    %44 = arith.addf %38, %43 : vector<8x256xf32>
    %45 = vector.extract_strided_slice %3 {offsets = [0, 6], sizes = [8, 1], strides = [1, 1]} : vector<8x8xf32> to vector<8x1xf32>
    %46 = vector.extract_strided_slice %5 {offsets = [6, 0], sizes = [1, 256], strides = [1, 1]} : vector<8x256xf32> to vector<1x256xf32>
    %47 = vector.broadcast %45 : vector<8x1xf32> to vector<8x256xf32>
    %48 = vector.broadcast %46 : vector<1x256xf32> to vector<8x256xf32>
    %49 = arith.mulf %47, %48 : vector<8x256xf32>
    %50 = arith.addf %44, %49 : vector<8x256xf32>
    %51 = vector.extract_strided_slice %3 {offsets = [0, 7], sizes = [8, 1], strides = [1, 1]} : vector<8x8xf32> to vector<8x1xf32>
    %52 = vector.extract_strided_slice %5 {offsets = [7, 0], sizes = [1, 256], strides = [1, 1]} : vector<8x256xf32> to vector<1x256xf32>
    %53 = vector.broadcast %51 : vector<8x1xf32> to vector<8x256xf32>
    %54 = vector.broadcast %52 : vector<1x256xf32> to vector<8x256xf32>
    %55 = arith.mulf %53, %54 : vector<8x256xf32>
    %56 = arith.addf %50, %55 : vector<8x256xf32>
    %cst_7 = arith.constant 0.000000e+00 : f32
    %57 = vector.broadcast %cst_7 : f32 to vector<8x256xf32>
    %58 = arith.maximumf %56, %57 : vector<8x256xf32>
    %59 = arith.truncf %58 : vector<8x256xf32> to vector<8x256xbf16>
    %c0_8 = arith.constant 0 : index
    %c0_9 = arith.constant 0 : index
    %60 = vector.load %arg3[%c0_8, %c0_9] : memref<256x256xbf16, #tpu.memory_space<vmem>>, vector<256x256xbf16>
    %cst_10 = arith.constant dense<0.000000e+00> : vector<8x256xf32>
    %61 = tpu.matmul %59, %60, %cst_10 {dimension_numbers = #tpu.dot_dimension_numbers<[1], [0], [0], [1], [0, 0, 1, 1], [], []>} : vector<8x256xbf16>, vector<256x256xbf16>, vector<8x256xf32> -> vector<8x256xf32>
    %62 = vector.broadcast %1 : vector<1x256xf32> to vector<8x256xf32>
    %63 = arith.addf %61, %62 : vector<8x256xf32>
    %cst_11 = arith.constant 0.000000e+00 : f32
    %64 = vector.broadcast %cst_11 : f32 to vector<8x256xf32>
    %65 = arith.maximumf %63, %64 : vector<8x256xf32>
    %c0_12 = arith.constant 0 : index
    %c0_13 = arith.constant 0 : index
    %66 = vector.load %arg4[%c0_12, %c0_13] : memref<1x256xbf16, #tpu.memory_space<vmem>>, vector<1x256xbf16>
    %67 = arith.truncf %65 : vector<8x256xf32> to vector<8x256xbf16>
    %cst_14 = arith.constant dense<0.000000e+00> : vector<1x8xf32>
    %68 = tpu.matmul %66, %67, %cst_14 {dimension_numbers = #tpu.dot_dimension_numbers<[1], [1], [0], [0], [0, 0, 1, 0], [], []>} : vector<1x256xbf16>, vector<8x256xbf16>, vector<1x8xf32> -> vector<1x8xf32>
    %69 = vector.broadcast %2 : vector<1x1xf32> to vector<1x8xf32>
    %70 = arith.addf %68, %69 : vector<1x8xf32>
    %c0_15 = arith.constant 0 : index
    %c0_16 = arith.constant 0 : index
    %71 = vector.load %arg6[%c0_15, %c0_16] : memref<1x8xf32, #tpu.memory_space<vmem>>, vector<1x8xf32>
    tpu.vector_store %arg6[%c0_15, %c0_16], %70 {strides = array<i32>} : memref<1x8xf32, #tpu.memory_space<vmem>>, vector<1x8xf32>,
    return
  }
  func.func @transform_0(%arg0: i32) -> (i32, i32) {
    %c0_i32 = arith.constant 0 : i32
    %c0_i32_0 = arith.constant 0 : i32
    return %arg0, %c0_i32 : i32, i32
  }
  func.func @transform_1(%arg0: i32) -> (i32, i32) {
    %c0_i32 = arith.constant 0 : i32
    %c0_i32_0 = arith.constant 0 : i32
    %c0_i32_1 = arith.constant 0 : i32
    return %c0_i32, %c0_i32_0 : i32, i32
  }
  func.func @transform_2(%arg0: i32) -> (i32, i32) {
    %c0_i32 = arith.constant 0 : i32
    %c0_i32_0 = arith.constant 0 : i32
    %c0_i32_1 = arith.constant 0 : i32
    return %c0_i32, %c0_i32_0 : i32, i32
  }
  func.func @transform_3(%arg0: i32) -> (i32, i32) {
    %c0_i32 = arith.constant 0 : i32
    %c0_i32_0 = arith.constant 0 : i32
    %c0_i32_1 = arith.constant 0 : i32
    return %c0_i32, %c0_i32_0 : i32, i32
  }
  func.func @transform_4(%arg0: i32) -> (i32, i32) {
    %c0_i32 = arith.constant 0 : i32
    %c0_i32_0 = arith.constant 0 : i32
    %c0_i32_1 = arith.constant 0 : i32
    return %c0_i32, %c0_i32_0 : i32, i32
  }
  func.func @transform_5(%arg0: i32) -> (i32, i32) {
    %c0_i32 = arith.constant 0 : i32
    %c0_i32_0 = arith.constant 0 : i32
    return %arg0, %c0_i32 : i32, i32
  }
}

</mosaic_0001>

<bundles_post_ra>
// kernel: tpu_custom_call.1
= control target key start
LH: loop header
LB: loop body
LE: loop exit
PB: predicated region body
PF: predicated region fallthrough
CT: control target
= control target key end

     0   :  { %10 = vsyncpa [#allocation3], 0  ;;  %s872_s0 = inlined_call_operand.hbm [shape: f32[8,8], index: 0, kind: input, shape index: {}]   ;;  %s873_s1 = inlined_call_operand.hbm [shape: bf16[8,256], index: 1, kind: input, shape index: {}]   ;;  %s874_s2 = inlined_call_operand.hbm [shape: bf16[256,256], index: 2, kind: input, shape index: {}]   ;;  %s875_s3 = inlined_call_operand.vmem [shape: bf16[1,256], index: 3, kind: input, shape index: {}]   ;;  %s876_s4 = inlined_call_operand.hbm [shape: f32[3,256], index: 4, kind: input, shape index: {}]   ;;  %s877_s5 = inlined_call_operand.hbm [shape: f32[1,8], index: 5, kind: output, shape index: {}]  }
   0x1   :  { %11 = vsyncpa [#allocation6], 0 }
   0x2   :  { %12 = vsyncpa [#allocation9], 0  ;;  %s30_s20 = sshll.u32 %s873_s1, 4  ;;  %s31_s20 = int_to_ptr.hbm [resolvable:$true] %s30_s20 }
   0x3   :  { %13 = vsyncpa [#allocation4], 0  ;;  %s808_s21 = smov [#allocation5]   ;;  %s19_s25 = sshll.u32 %s872_s0, 4  ;;  %s20_s25 = int_to_ptr.hbm [resolvable:$true] %s19_s25 }
   0x4   :  { %s32_s22 = sshll.u32 %s808_s21, 4  ;;  %s809_s26 = smov [#allocation2]   ;;  %s33_s22 = int_to_ptr.vmem [resolvable:$true] %s32_s22 }
   0x5   :  { %35 = dma.hbm_to_vmem [thread:$0]  %s31_s20, 128, %s33_s22, [#allocation6]  }
   0x6   :  { %s21_s27 = sshll.u32 %s809_s26, 4  ;;  %s40_s30 = sshll.u32 %s874_s2, 4  ;;  %s22_s27 = int_to_ptr.vmem [resolvable:$true] %s21_s27  ;;  %s41_s30 = int_to_ptr.hbm [resolvable:$true] %s40_s30 }
   0x7   :  { %24 = dma.hbm_to_vmem [thread:$0]  %s20_s25, 128, %s22_s27, [#allocation3]  }
   0x8   :  { %s810_s1 = smov [#allocation7]   ;;  %s56_s9 = sshll.u32 %s876_s4, 4  ;;  %s57_s9 = int_to_ptr.hbm [resolvable:$true] %s56_s9 }
   0x9   :  { %s42_s6 = sshll.u32 %s810_s1, 4  ;;  %s811_s10 = smov 128   ;;  %s43_s6 = int_to_ptr.vmem [resolvable:$true] %s42_s6 }
   0xa   :  { %s812_s0 = smov 8   ;;  %s813_s11 = smov [#allocation8]  }
   0xb   :  { %48 = dma.hbm_to_vmem [thread:$0]  %s41_s30, 4096, %s43_s6, [#allocation6], %s811_s10, %s811_s10, %s812_s0  }
   0xc   :  { %s58_s12 = sshll.u32 %s813_s11, 4  ;;  %s59_s12 = int_to_ptr.vmem [resolvable:$true] %s58_s12 }
   0xd   :  { %61 = dma.hbm_to_vmem [thread:$0]  %s57_s9, 128, %s59_s12, [#allocation9]  }
   0xe   :  { %800 = dma.done.wait [#allocation3], 128  }
   0xf   :  { %801 = vsyncadd [#allocation3], 4294967168 }
  0x10   :  { %802 = dma.done.wait [#allocation6], 4224  }
  0x11   :  { %803 = vsyncadd [#allocation6], 4294963072 }
  0x12   :  { %804 = dma.done.wait [#allocation9], 128  }
  0x13   :  { %805 = vsyncadd [#allocation9], 4294967168  ;;  %v814_v0 = vmov 0   ;;  %v815_v1 = vmov 2   ;;  %v816_v2 = vmov 4   ;;  %v83_v3 = vld [vmem:[#allocation2] sm:$0xff] }
  0x14   :  { %671 = vset.pattern.permute.xlu0 %v814_v0  ;;  %673 = vset.pattern.permute.xlu1 %v815_v1  ;;  %v553_v4 = vld [vmem:[#allocation7 + $0x70] sm:$0xf]  ;;  %v638_v5 = vld [vmem:[#allocation7 + $0x74] sm:$0xf0]  ;;  %v637_v9 = vld [vmem:[#allocation7 + $0x74] sm:$0xf] }
  0x15   :  { %675 = vset.pattern.permute.xlu2 %v816_v2  ;;  %96 = vperm.xlu0 %671, %v83_v3   ;;  %v554_v6 = vor.u32 %v638_v5, %v553_v4  ;;  %v617_v7 = vld [vmem:[#allocation7 + $0xf0] sm:$0xf]  ;;  %v654_v8 = vld [vmem:[#allocation7 + $0xf4] sm:$0xf0]  ;;  %v555_v11 = vld [vmem:[#allocation7 + $0x78] sm:$0xf0] }
  0x16   :  { %116 = vperm.xlu1 %673, %v83_v3   ;;  %136 = vperm.xlu2 %675, %v83_v3   ;;  %v618_v10 = vor.u32 %v654_v8, %v617_v7  ;;  %v653_v12 = vld [vmem:[#allocation7 + $0xf4] sm:$0xf]  ;;  %v619_v13 = vld [vmem:[#allocation7 + $0xf8] sm:$0xf0]  ;;  %v558_v14 = vor.u32 %v637_v9, %v555_v11  ;;  %v817_v16 = vmov 1   ;;  %v818_v17 = vmov 3  }
  0x17   :  { %376 = vmatpush.bf16.msra.mxu0 %v554_v6  ;;  %v622_v15 = vor.u32 %v653_v12, %v619_v13  ;;  %v819_v18 = vmov 5   ;;  %v820_v19 = vmov 6   ;;  %v821_v20 = vmov 7   ;;  %v545_v21 = vld [vmem:[#allocation7 + $0x60] sm:$0xf]  ;;  %s483_s16 = sshll.u32 %s877_s5, 4  ;;  %s484_s16 = int_to_ptr.hbm [resolvable:$true] %s483_s16 }
  0x18   :  { %389 = vmatpush.bf16.msra.mxu1 %v618_v10  ;;  %402 = vmatpush.bf16.msra.mxu2 %v558_v14  ;;  %v636_v22 = vld [vmem:[#allocation7 + $0x64] sm:$0xf0]  ;;  %v609_v24 = vld [vmem:[#allocation7 + $0xe0] sm:$0xf]  ;;  %v635_v26 = vld [vmem:[#allocation7 + $0x64] sm:$0xf] }
  0x19   :  { %415 = vmatpush.bf16.msra.mxu3 %v622_v15  ;;  %v546_v23 = vor.u32 %v636_v22, %v545_v21  ;;  %v652_v25 = vld [vmem:[#allocation7 + $0xe4] sm:$0xf0]  ;;  %v547_v28 = vld [vmem:[#allocation7 + $0x68] sm:$0xf0]  ;;  %v651_v29 = vld [vmem:[#allocation7 + $0xe4] sm:$0xf] }
  0x1a   :  { %v610_v27 = vor.u32 %v652_v25, %v609_v24  ;;  %v611_v30 = vld [vmem:[#allocation7 + $0xe8] sm:$0xf0]  ;;  %v550_v31 = vor.u32 %v635_v26, %v547_v28  ;;  %v537_v33 = vld [vmem:[#allocation7 + $0x50] sm:$0xf]  ;;  %v634_v34 = vld [vmem:[#allocation7 + $0x54] sm:$0xf0] }
  0x1b   :  { %377 = vmatpush.bf16.msra.mxu0 %v546_v23  ;;  %v614_v32 = vor.u32 %v651_v29, %v611_v30  ;;  %v538_v35 = vor.u32 %v634_v34, %v537_v33  ;;  %v601_v36 = vld [vmem:[#allocation7 + $0xd0] sm:$0xf]  ;;  %v650_v37 = vld [vmem:[#allocation7 + $0xd4] sm:$0xf0]  ;;  %v633_v38 = vld [vmem:[#allocation7 + $0x54] sm:$0xf] }
  0x1c   :  { %390 = vmatpush.bf16.msra.mxu1 %v610_v27  ;;  %403 = vmatpush.bf16.msra.mxu2 %v550_v31  ;;  %v602_v39 = vor.u32 %v650_v37, %v601_v36  ;;  %v539_v40 = vld [vmem:[#allocation7 + $0x58] sm:$0xf0]  ;;  %v649_v41 = vld [vmem:[#allocation7 + $0xd4] sm:$0xf]  ;;  %v529_v45 = vld [vmem:[#allocation7 + $0x40] sm:$0xf] }
  0x1d   :  { %672 = vset.pattern.permute.xlu0 %v817_v16  ;;  %416 = vmatpush.bf16.msra.mxu3 %v614_v32  ;;  %v603_v42 = vld [vmem:[#allocation7 + $0xd8] sm:$0xf0]  ;;  %v542_v43 = vor.u32 %v633_v38, %v539_v40  ;;  %v632_v46 = vld [vmem:[#allocation7 + $0x44] sm:$0xf0]  ;;  %v593_v47 = vld [vmem:[#allocation7 + $0xc0] sm:$0xf] }
  0x1e   :  { %674 = vset.pattern.permute.xlu1 %v818_v17  ;;  %106 = vperm.xlu0 %672, %v83_v3   ;;  %v606_v44 = vor.u32 %v649_v41, %v603_v42  ;;  %v530_v48 = vor.u32 %v632_v46, %v529_v45  ;;  %v648_v49 = vld [vmem:[#allocation7 + $0xc4] sm:$0xf0]  ;;  %v631_v50 = vld [vmem:[#allocation7 + $0x44] sm:$0xf]  ;;  %v531_v52 = vld [vmem:[#allocation7 + $0x48] sm:$0xf0] }
  0x1f   :  { %126 = vperm.xlu1 %674, %v83_v3   ;;  %676 = vset.pattern.permute.xlu2 %v819_v18  ;;  %v594_v51 = vor.u32 %v648_v49, %v593_v47  ;;  %v647_v53 = vld [vmem:[#allocation7 + $0xc4] sm:$0xf]  ;;  %v595_v54 = vld [vmem:[#allocation7 + $0xc8] sm:$0xf0]  ;;  %v534_v55 = vor.u32 %v631_v50, %v531_v52  ;;  %v521_v57 = vld [vmem:[#allocation7 + $0x30] sm:$0xf] }
  0x20   :  { %146 = vperm.xlu2 %676, %v83_v3   ;;  %378 = vmatpush.bf16.msra.mxu0 %v538_v35  ;;  %v598_v56 = vor.u32 %v647_v53, %v595_v54  ;;  %v630_v58 = vld [vmem:[#allocation7 + $0x34] sm:$0xf0]  ;;  %v585_v59 = vld [vmem:[#allocation7 + $0xb0] sm:$0xf]  ;;  %v629_v62 = vld [vmem:[#allocation7 + $0x34] sm:$0xf] }
  0x21   :  { %391 = vmatpush.bf16.msra.mxu1 %v602_v39  ;;  %404 = vmatpush.bf16.msra.mxu2 %v542_v43  ;;  %v522_v60 = vor.u32 %v630_v58, %v521_v57  ;;  %v646_v61 = vld [vmem:[#allocation7 + $0xb4] sm:$0xf0]  ;;  %v523_v63 = vld [vmem:[#allocation7 + $0x38] sm:$0xf0]  ;;  %v645_v2 = vld [vmem:[#allocation7 + $0xb4] sm:$0xf] }
  0x22   :  { %417 = vmatpush.bf16.msra.mxu3 %v606_v44  ;;  %v526_v1 = vor.u32 %v629_v62, %v523_v63  ;;  %v513_v5 = vld [vmem:[#allocation7 + $0x20] sm:$0xf]  ;;  %v628_v6 = vld [vmem:[#allocation7 + $0x24] sm:$0xf0]  ;;  %v627_v10 = vld [vmem:[#allocation7 + $0x24] sm:$0xf] }
  0x23   :  { %v577_v7 = vld [vmem:[#allocation7 + $0xa0] sm:$0xf]  ;;  %v514_v8 = vor.u32 %v628_v6, %v513_v5  ;;  %v644_v9 = vld [vmem:[#allocation7 + $0xa4] sm:$0xf0]  ;;  %v515_v11 = vld [vmem:[#allocation7 + $0x28] sm:$0xf0] }
  0x24   :  { %379 = vmatpush.bf16.msra.mxu0 %v530_v48  ;;  %v578_v12 = vor.u32 %v644_v9, %v577_v7  ;;  %v518_v13 = vor.u32 %v627_v10, %v515_v11  ;;  %v643_v14 = vld [vmem:[#allocation7 + $0xa4] sm:$0xf]  ;;  %v579_v15 = vld [vmem:[#allocation7 + $0xa8] sm:$0xf0]  ;;  %v505_v17 = vld [vmem:[#allocation7 + $0x10] sm:$0xf] }
  0x25   :  { %392 = vmatpush.bf16.msra.mxu1 %v594_v51  ;;  %405 = vmatpush.bf16.msra.mxu2 %v534_v55  ;;  %v582_v16 = vor.u32 %v643_v14, %v579_v15  ;;  %v626_v18 = vld [vmem:[#allocation7 + $0x14] sm:$0xf0]  ;;  %v625_v22 = vld [vmem:[#allocation7 + $0x14] sm:$0xf]  ;;  %v507_v24 = vld [vmem:[#allocation7 + $0x18] sm:$0xf0] }
  0x26   :  { %679 = vset.pattern.permute.xlu0 %v814_v0  ;;  %418 = vmatpush.bf16.msra.mxu3 %v598_v56  ;;  %v586_v0 = vor.u32 %v646_v61, %v585_v59  ;;  %v642_v21 = vld [vmem:[#allocation7 + $0x94] sm:$0xf0]  ;;  %v641_v25 = vld [vmem:[#allocation7 + $0x94] sm:$0xf]  ;;  %v571_v26 = vld [vmem:[#allocation7 + $0x98] sm:$0xf0]  ;;  %v510_v27 = vor.u32 %v625_v22, %v507_v24 }
  0x27   :  { %677 = vset.pattern.permute.xlu1 %v820_v19  ;;  %v506_v19 = vor.u32 %v626_v18, %v505_v17  ;;  %v574_v28 = vor.u32 %v641_v25, %v571_v26  ;;  %v497_v29 = vld [vmem:[#allocation7] sm:$0xf]  ;;  %v624_v30 = vld [vmem:[#allocation7 + $0x4] sm:$0xf0]  ;;  %v623_v34 = vld [vmem:[#allocation7 + $0x4] sm:$0xf] }
  0x28   :  { %156 = vperm.xlu1 %677, %v83_v3   ;;  %678 = vset.pattern.permute.xlu2 %v821_v20  ;;  %v569_v20 = vld [vmem:[#allocation7 + $0x90] sm:$0xf]  ;;  %v561_v31 = vld [vmem:[#allocation7 + $0x80] sm:$0xf]  ;;  %v498_v32 = vor.u32 %v624_v30, %v497_v29  ;;  %v640_v33 = vld [vmem:[#allocation7 + $0x84] sm:$0xf0] }
  0x29   :  { %166 = vperm.xlu2 %678, %v83_v3   ;;  %v587_v3 = vld [vmem:[#allocation7 + $0xb8] sm:$0xf0]  ;;  %380 = vmatpush.bf16.msra.mxu0 %v522_v60  ;;  %v570_v23 = vor.u32 %v642_v21, %v569_v20  ;;  %v499_v35 = vld [vmem:[#allocation7 + $0x8] sm:$0xf0]  ;;  %v562_v36 = vor.u32 %v640_v33, %v561_v31  ;;  %v639_v37 = vld [vmem:[#allocation7 + $0x84] sm:$0xf] }
  0x2a   :  { %v590_v4 = vor.u32 %v645_v2, %v587_v3  ;;  %393 = vmatpush.bf16.msra.mxu1 %v586_v0  ;;  %406 = vmatpush.bf16.msra.mxu2 %v526_v1  ;;  %v563_v38 = vld [vmem:[#allocation7 + $0x88] sm:$0xf0]  ;;  %v502_v39 = vor.u32 %v623_v34, %v499_v35  ;;  %v84_v41 = vld [vmem:[#allocation5] sm:$0xff]  ;;  %v79_v49 = vld [vmem:[#allocation8] ss:$4 sm:$0x3] }
  0x2b   :  { %v566_v40 = vor.u32 %v639_v37, %v563_v38  ;;  %v85_v43 = vunpack.c.l.bf16 %v84_v41  ;;  %v86_v44 = vunpack.c.h.bf16 %v84_v41  ;;  %v88_v50 = vperm.slane %v79_v49, 0 }
  0x2c   :  { %419 = vmatpush.bf16.msra.mxu3 %v590_v4  ;;  %v89_v51 = vperm.slane %v79_v49, 1  ;;  %vm474_vm0 = vcmask 57344  }
  0x2d   :  { %381 = vmatpush.bf16.msra.mxu0 %v514_v8  ;;  %v99_v47 = vperm.slane %v85_v43, 0  ;;  %v100_v48 = vperm.slane %v86_v44, 0  ;;  %v109_v54 = vperm.slane %v85_v43, 1  ;;  %v110_v55 = vperm.slane %v86_v44, 1 }
  0x2e   :  { %394 = vmatpush.bf16.msra.mxu1 %v578_v12  ;;  %407 = vmatpush.bf16.msra.mxu2 %v518_v13  ;;  %v119_v57 = vperm.slane %v85_v43, 2  ;;  %v120_v58 = vperm.slane %v86_v44, 2  ;;  %v129_v60 = vperm.slane %v85_v43, 3  ;;  %v130_v61 = vperm.slane %v86_v44, 3 }
  0x2f   :  { %v139_v3 = vperm.slane %v85_v43, 4  ;;  %v140_v4 = vperm.slane %v86_v44, 4  ;;  %v149_v9 = vperm.slane %v85_v43, 5  ;;  %v150_v10 = vperm.slane %v86_v44, 5 }
  0x30   :  { %420 = vmatpush.bf16.msra.mxu3 %v582_v16  ;;  %v159_v17 = vperm.slane %v85_v43, 6  ;;  %v160_v18 = vperm.slane %v86_v44, 6  ;;  %v169_v21 = vperm.slane %v85_v43, 7  ;;  %v170_v22 = vperm.slane %v86_v44, 7  ;;  %v430_v43 = vld [vmem:[%s875_s3] sm:$0x3] }
  0x31   :  { %382 = vmatpush.bf16.msra.mxu0 %v506_v19  ;;  %443 = vst [vmem:[#allocation1] ss:$9 sm:$0xff] %v430_v43  ;;  %v82_v44 = vld [vmem:[#allocation8 + $0x2] sm:$0x1]  ;;  %s823_s3 = smov [#allocation10]  }
  0x32   :  { %395 = vmatpush.bf16.msra.mxu1 %v570_v23  ;;  %408 = vmatpush.bf16.msra.mxu2 %v510_v27  ;;  %s481_s13 = sshll.u32 %s823_s3, 4  ;;  %s482_s13 = int_to_ptr.vmem [resolvable:$true] %s481_s13 }
  0x33   :  { %435 = vperm.xlu0 %679, %v82_v44  }
  0x34   :  { %421 = vmatpush.bf16.msra.mxu3 %v574_v28 }
  0x35   :  { %383 = vmatpush.bf16.msra.mxu0 %v498_v32 }
  0x36   :  { %396 = vmatpush.bf16.msra.mxu1 %v562_v36  ;;  %409 = vmatpush.bf16.msra.mxu2 %v502_v39 }
  0x38   :  { %422 = vmatpush.bf16.msra.mxu3 %v566_v40 }
  0x70   :  { %v137_v42 = vpop.permute.xlu2 %136 }
  0x71   :  { %v141_v15 = vmul.f32 %v139_v3, %v137_v42  ;;  %v142_v16 = vmul.f32 %v140_v4, %v137_v42 }
  0x7a   :  { %v147_v56 = vpop.permute.xlu2 %146 }
  0x7b   :  { %v151_v26 = vmul.f32 %v149_v9, %v147_v56  ;;  %v152_v27 = vmul.f32 %v150_v10, %v147_v56 }
  0x83   :  { %v167_v23 = vpop.permute.xlu2 %166 }
  0x84   :  { %v171_v33 = vmul.f32 %v169_v21, %v167_v23  ;;  %v172_v34 = vmul.f32 %v170_v22, %v167_v23 }
  0x87   :  { %v97_v45 = vpop.permute.xlu0 %96 }
  0x88   :  { %v117_v46 = vpop.permute.xlu1 %116  ;;  %v101_v52 = vmul.f32 %v99_v47, %v97_v45  ;;  %v102_v53 = vmul.f32 %v100_v48, %v97_v45  ;;  %v81_v45 = vld [vmem:[#allocation8 + $0x1] ss:$4 sm:$0x3] }
  0x89   :  { %v121_v5 = vmul.f32 %v119_v57, %v117_v46  ;;  %v122_v6 = vmul.f32 %v120_v58, %v117_v46  ;;  %v212_v46 = vperm.slane %v81_v45, 0 }
  0x8a   :  { %v103_v63 = vadd.f32 %v101_v52, %v88_v50  ;;  %v104_v0 = vadd.f32 %v102_v53, %v89_v51  ;;  %v213_v51 = vperm.slane %v81_v45, 1 }
  0x90   :  { %v107_v59 = vpop.permute.xlu0 %106 }
  0x91   :  { %v127_v62 = vpop.permute.xlu1 %126  ;;  %v111_v1 = vmul.f32 %v109_v54, %v107_v59  ;;  %v112_v2 = vmul.f32 %v110_v55, %v107_v59 }
  0x92   :  { %v131_v13 = vmul.f32 %v129_v60, %v127_v62  ;;  %v132_v14 = vmul.f32 %v130_v61, %v127_v62  ;;  %v444_v61 = vld [vmem:[#allocation1] sm:$0xff] }
  0x93   :  { %v113_v7 = vadd.f32 %v111_v1, %v103_v63  ;;  %v114_v8 = vadd.f32 %v112_v2, %v104_v0  ;;  %v445_v1 = vld [vmem:[#allocation1 + $0x9] sm:$0xff]  ;;  %v822_v2 = vmov 839922192  }
  0x94   :  { %v439_v3 = vunpack.c.l.s4 %v822_v2 }
  0x95   :  { %v123_v11 = vadd.f32 %v121_v5, %v113_v7  ;;  %v124_v12 = vadd.f32 %v122_v6, %v114_v8 }
  0x96   :  { %v440_v4 = vunpack.c.0.s8 %v439_v3 }
  0x97   :  { %v133_v19 = vadd.f32 %v131_v13, %v123_v11  ;;  %v134_v20 = vadd.f32 %v132_v14, %v124_v12 }
  0x99   :  { %v143_v24 = vadd.f32 %v141_v15, %v133_v19  ;;  %v144_v25 = vadd.f32 %v142_v16, %v134_v20 }
  0x9a   :  { %v157_v28 = vpop.permute.xlu1 %156 }
  0x9b   :  { %v161_v29 = vmul.f32 %v159_v17, %v157_v28  ;;  %v162_v30 = vmul.f32 %v160_v18, %v157_v28  ;;  %v153_v31 = vadd.f32 %v151_v26, %v143_v24  ;;  %v154_v32 = vadd.f32 %v152_v27, %v144_v25 }
  0x9d   :  { %v163_v35 = vadd.f32 %v161_v29, %v153_v31  ;;  %v164_v36 = vadd.f32 %v162_v30, %v154_v32 }
  0x9f   :  { %v173_v37 = vadd.f32 %v171_v33, %v163_v35  ;;  %v174_v38 = vadd.f32 %v172_v34, %v164_v36 }
  0xa1   :  { %v175_v39 = vmax.f32 %v173_v37, 0.0  ;;  %v176_v40 = vmax.f32 %v174_v38, 0.0 }
  0xa3   :  { %v177_v41 = vpack.c.bf16 %v175_v39, %v175_v39  ;;  %v178_v42 = vpack.c.bf16 %v176_v40, %v176_v40 }
  0xa5   :  { %384 = vmatmul.bf16.vlgmr.msra.gmra.mxu0 %v177_v41  ;;  %397 = vmatmul.bf16.vlgmr.msra.gmra.mxu1 %v178_v42  ;;  %v436_v5 = vpop.permute.xlu0 %435 }
  0xa6   :  { %410 = vmatmul.bf16.vlgmr.msra.gmra.mxu2 %v177_v41  ;;  %423 = vmatmul.bf16.vlgmr.msra.gmra.mxu3 %v178_v42  ;;  %v441_v7 = vperm.slane %v436_v5, %v440_v4 }
 0x122   :  { %v385_v47 = vpop.f32.mrf.mxu0  ;;  %v398_v48 = vpop.f32.mrf.mxu1 }
 0x123   :  { %v386_v49 = vadd.f32 %v385_v47, %v212_v46 }
 0x125   :  { %v399_v50 = vadd.f32 %v398_v48, %v386_v49 }
 0x127   :  { %v428_v52 = vmax.f32 %v399_v50, 0.0 }
 0x129   :  { %v411_v53 = vpop.f32.mrf.mxu2  ;;  %v424_v54 = vpop.f32.mrf.mxu3  ;;  %v431_v55 = vpack.c.bf16 %v428_v52, %v428_v52 }
 0x12a   :  { %v412_v56 = vadd.f32 %v411_v53, %v213_v51  ;;  %v387_v57 = vpop.f32.mrf.mxu0  ;;  %v400_v58 = vpop.f32.mrf.mxu1 }
 0x12b   :  { %455 = vmatpush.bf16.xpose.msrb.mxu0 %v431_v55 }
 0x12c   :  { %v425_v59 = vadd.f32 %v424_v54, %v412_v56 }
 0x12e   :  { %v429_v60 = vmax.f32 %v425_v59, 0.0 }
 0x130   :  { %v432_v62 = vpack.c.bf16 %v429_v60, %v429_v60 }
 0x131   :  { %v413_v63 = vpop.f32.mrf.mxu2  ;;  %v426_v0 = vpop.f32.mrf.mxu3 }
 0x132   :  { %468 = vmatpush.bf16.xpose.msrb.mxu1 %v432_v62  ;;  %456 = vmatmul.bf16.vlgmr.msrb.gmra.mxu0 %v444_v61 }
 0x139   :  { %469 = vmatmul.bf16.vlgmr.msrb.gmra.mxu1 %v445_v1 }
 0x1af   :  { %v457_v6 = vpop.f32.mrf.mxu0 }
 0x1b0   :  { %v458_v8 = vadd.f32 %v457_v6, %v441_v7 }
 0x1b6   :  { %v470_v9 = vpop.f32.mrf.mxu1 }
 0x1b7   :  { %v471_v10 = vadd.f32 %v470_v9, %v458_v8  ;;  %v459_v11 = vpop.f32.mrf.mxu0 }
 0x1b9   :  { %475 = vst.msk [vmem:[#allocation10] sm:$0x1] %vm474_vm0, %v471_v10 }
 0x1ba   :  { %486 = dma.vmem_to_hbm [thread:$0]  %s482_s13, 16, %s484_s16, [#allocation4]  }
 0x1be   :  { %v472_v12 = vpop.f32.mrf.mxu1 }
 0x1bf   :  { %806 = dma.done.wait [#allocation4], 16  }
 0x1c0   :  { %807 = vsyncadd [#allocation4], 4294967280 }
 0x1c1   :  { %491 = vsyncpa [#allocation3], 1 }
 0x1c2   :  { %492 = vsyncpa [#allocation6], 1 }
 0x1c3   :  { %493 = vsyncpa [#allocation9], 1 }
 0x1c4   :  { %494 = vsyncpa [#allocation4], 1 }

</bundles_post_ra>
